<compile_context>
chip_gen: v6e
topology: v6e:2x2x1
jax: 0.10.0
libtpu: 0.0.40
codegen_flags: <defaults>
</compile_context>

<pallas_src>
import math

import jax
import jax.numpy as jnp
from jax.experimental import pallas as pl
from jax.experimental.pallas import tpu as pltpu


def make_positional_encoding_table(
    d_model: int, max_len: int = 5000, dtype=jnp.float32
) -> jnp.ndarray:
    """Deterministic buffer, identical to the PyTorch __init__.

    Build this ONCE at model init in the model dtype (so the forward wrapper
    never has to slice or cast it per call).
    """
    assert d_model % 2 == 0, "d_model must be even (same limitation as the PyTorch snippet)"
    position = jnp.arange(0, max_len, dtype=jnp.float32)[:, None]               # (max_len, 1)
    div_term = jnp.exp(
        jnp.arange(0, d_model, 2, dtype=jnp.float32) * (-math.log(10000.0) / d_model)
    )                                                                            # (d_model/2,)
    angles = position * div_term                                                 # (max_len, d_model/2)
    pe = jnp.zeros((max_len, d_model), dtype=jnp.float32)
    pe = pe.at[:, 0::2].set(jnp.sin(angles))
    pe = pe.at[:, 1::2].set(jnp.cos(angles))
    return pe[None, :, :].astype(dtype)                                          # (1, max_len, d_model)


def _pos_enc_kernel(x_ref, pe_ref, o_ref):
    # x_ref: (b, tS, D), pe_ref: (1, tS, D), o_ref: (b, tS, D).
    # Pure VPU elementwise add; pe broadcasts over the leading (batch) dim.
    o_ref[...] = x_ref[...] + pe_ref[...]


def _sublane_rows(dtype) -> int:
    """Native row packing along sublanes: 8 for f32, 16 for bf16, 32 for int8/fp8."""
    return max(8, 32 // jnp.dtype(dtype).itemsize)


def _round_up(x: int, m: int) -> int:
    return -(-x // m) * m


def _choose_seq_tile(
    S: int,
    D: int,
    dtype,
    vmem_budget_bytes: int,
    live_row_buffers: int,
    want_two_seq_blocks: bool,
) -> int:
    """Fixed-target sequence tile for a cdiv grid (no divisor-of-S search).

    live_row_buffers = number of simultaneously-live (tS, D) buffers
    (double-buffered x / pe / out, batch-folded or not).
    """
    sub = _sublane_rows(dtype)
    itemsize = jnp.dtype(dtype).itemsize
    # ~2 MiB worth of rows at D=1024: 512 rows f32, 1024 bf16, 2048 int8.
    target = 512 * (4 // itemsize) if itemsize <= 4 else 512
    # Rows allowed by the VMEM budget, rounded down to the native packing.
    cap = vmem_budget_bytes // (live_row_buffers * D * itemsize)
    cap = max(sub, (cap // sub) * sub)
    t = max(sub, min(target, cap))
    # Never bigger than the (sublane-padded) sequence extent.
    t = min(t, _round_up(S, sub))
    if want_two_seq_blocks and S > sub:
        # v7x megacore: guarantee >= 2 sequence blocks so both TCs get work.
        t = min(t, _round_up(pl.cdiv(S, 2), sub))
    return max(sub, t)


def positional_encoding_forward(
    x: jnp.ndarray,
    pe: jnp.ndarray,
    *,
    vmem_budget_bytes: int = 24 << 20,
    donate_x: bool = False,
    fold_batch_max: int = 4,
) -> jnp.ndarray:
    """out = x + pe[:, :x.shape[1]]  via a tiled Pallas kernel.

    `pe` is the full (1, max_len, d_model) table built once at init (ideally
    already in x.dtype); the BlockSpec windows the first S rows, so no per-call
    slicing is needed.  donate_x=True writes the result in place.
    """
    B, S, D = x.shape
    assert pe.ndim == 3 and pe.shape[0] == 1 and pe.shape[1] >= S and pe.shape[2] == D

    # Safety net only -- the table should already be in the model dtype (built
    # at init by make_positional_encoding_table), so this is normally a no-op.
    if pe.dtype != x.dtype:
        pe = pe.astype(x.dtype)

    fold_batch = B <= fold_batch_max

    if fold_batch:
        # Single (sequence) grid axis; the block carries the whole batch and pe
        # is fetched exactly once per sequence tile.
        live_bufs = 4 * B + 2  # x,out double-buffered per batch row + pe double-buffered
        tS = _choose_seq_tile(S, D, x.dtype, vmem_budget_bytes, live_bufs,
                              want_two_seq_blocks=True)
        n_s = pl.cdiv(S, tS)
        grid = (n_s,)
        in_specs = [
            pl.BlockSpec((B, tS, D), lambda s: (0, s, 0)),   # x
            pl.BlockSpec((1, tS, D), lambda s: (0, s, 0)),   # pe (broadcast over batch)
        ]
        out_specs = pl.BlockSpec((B, tS, D), lambda s: (0, s, 0))
        dims = ("parallel",)
    else:
        # grid=(seq, batch) with batch innermost: pe's block index is constant
        # across consecutive steps, so its DMA is skipped and pe traffic is
        # amortized over the batch.
        live_bufs = 6  # x / pe / out, each double-buffered
        tS = _choose_seq_tile(S, D, x.dtype, vmem_budget_bytes, live_bufs,
                              want_two_seq_blocks=(B == 1))
        n_s = pl.cdiv(S, tS)
        grid = (n_s, B)
        in_specs = [
            pl.BlockSpec((1, tS, D), lambda s, b: (b, s, 0)),  # x
            pl.BlockSpec((1, tS, D), lambda s, b: (0, s, 0)),  # pe (batch-invariant)
        ]
        out_specs = pl.BlockSpec((1, tS, D), lambda s, b: (b, s, 0))
        dims = ("parallel", "parallel")

    extra_kwargs = {}
    if donate_x:
        extra_kwargs["input_output_aliases"] = {0: 0}

    # D is the lane axis; production d_model (512/1024/...) is a multiple of 128
    # and lowers to unmasked lane-dense stores.  Small demo D (<128) still
    # compiles (block == full dim) with masked partial stores.
    return pl.pallas_call(
        _pos_enc_kernel,
        out_shape=jax.ShapeDtypeStruct((B, S, D), x.dtype),
        grid_spec=pltpu.PrefetchScalarGridSpec(
            num_scalar_prefetch=0,
            grid=grid,
            in_specs=in_specs,
            out_specs=out_specs,
        ),
        compiler_params=pltpu.CompilerParams(
            dimension_semantics=dims,
            # Conservative scoped limit: raises v5e's 16 MiB default so the
            # ~2 MiB tiles double-buffer comfortably, while staying well under
            # v7x's 64 MiB physical VMEM.  Tile selection budgets 24 MiB.
            vmem_limit_bytes=32 << 20,
        ),
        **extra_kwargs,
    )(x, pe)


if __name__ == "__main__":
    # Small shapes consistent with the module's forward: (batch, seq, d_model).
    B, S, D = 2, 8, 32
    MAX_LEN = 64  # stand-in for max_len=5000 (only the first S rows are ever used)

    key = jax.random.PRNGKey(0)
    x = jax.random.normal(key, (B, S, D), dtype=jnp.float32)

    # Built once at "init" in the model dtype -- no per-call slice/cast traffic.
    pe = make_positional_encoding_table(D, MAX_LEN, dtype=x.dtype)

    out = positional_encoding_forward(x, pe)
    out = jax.block_until_ready(out)

    # Reference check against plain JAX semantics of the PyTorch forward.
    ref = x + pe[:, :S]
    assert out.shape == (B, S, D)
    assert jnp.allclose(out, ref, atol=1e-6, rtol=1e-6)

    print("KERNEL_OK")
</pallas_src>

<mosaic_0001>
module attributes {stable_mosaic.version = 11 : i64} {
  func.func @_pos_enc_kernel(%arg0: i32, %arg1: memref<2x8x32xf32, #tpu.memory_space<vmem>>, %arg2: memref<1x8x32xf32, #tpu.memory_space<vmem>>, %arg3: memref<2x8x32xf32, #tpu.memory_space<vmem>>) attributes {dimension_semantics = [#tpu.dimension_semantics<parallel>], iteration_bounds = array<i64: 1>, scalar_prefetch = 0 : i64, scratch_operands = 0 : i64, tpu.core_type = #tpu.core_type<tc>, window_params = [{transform_indices = @transform_0, window_bounds = array<i64: 2, 8, 32>}, {transform_indices = @transform_1, window_bounds = array<i64: 1, 8, 32>}, {transform_indices = @transform_2, window_bounds = array<i64: 2, 8, 32>}]} {
    %c0 = arith.constant 0 : index
    %c0_0 = arith.constant 0 : index
    %c0_1 = arith.constant 0 : index
    %0 = vector.load %arg1[%c0, %c0_0, %c0_1] : memref<2x8x32xf32, #tpu.memory_space<vmem>>, vector<2x8x32xf32>
    %c0_2 = arith.constant 0 : index
    %c0_3 = arith.constant 0 : index
    %c0_4 = arith.constant 0 : index
    %1 = vector.load %arg2[%c0_2, %c0_3, %c0_4] : memref<1x8x32xf32, #tpu.memory_space<vmem>>, vector<1x8x32xf32>
    %2 = vector.broadcast %1 : vector<1x8x32xf32> to vector<2x8x32xf32>
    %3 = arith.addf %0, %2 : vector<2x8x32xf32>
    %c0_5 = arith.constant 0 : index
    %c0_6 = arith.constant 0 : index
    %c0_7 = arith.constant 0 : index
    %4 = vector.load %arg3[%c0_5, %c0_6, %c0_7] : memref<2x8x32xf32, #tpu.memory_space<vmem>>, vector<2x8x32xf32>
    tpu.vector_store %arg3[%c0_5, %c0_6, %c0_7], %3 {strides = array<i32>} : memref<2x8x32xf32, #tpu.memory_space<vmem>>, vector<2x8x32xf32>,
    return
  }
  func.func @transform_0(%arg0: i32) -> (i32, i32, i32) {
    %c0_i32 = arith.constant 0 : i32
    %c0_i32_0 = arith.constant 0 : i32
    %c0_i32_1 = arith.constant 0 : i32
    return %c0_i32, %arg0, %c0_i32_0 : i32, i32, i32
  }
  func.func @transform_1(%arg0: i32) -> (i32, i32, i32) {
    %c0_i32 = arith.constant 0 : i32
    %c0_i32_0 = arith.constant 0 : i32
    %c0_i32_1 = arith.constant 0 : i32
    return %c0_i32, %arg0, %c0_i32_0 : i32, i32, i32
  }
  func.func @transform_2(%arg0: i32) -> (i32, i32, i32) {
    %c0_i32 = arith.constant 0 : i32
    %c0_i32_0 = arith.constant 0 : i32
    %c0_i32_1 = arith.constant 0 : i32
    return %c0_i32, %arg0, %c0_i32_0 : i32, i32, i32
  }
}

</mosaic_0001>

<bundles_post_ra>
// kernel: tpu_custom_call.1
= control target key start
LH: loop header
LB: loop body
LE: loop exit
PB: predicated region body
PF: predicated region fallthrough
CT: control target
= control target key end

     0   :  { %vm17_vm0 = vcmask 261120   ;;  %s91_s0 = inlined_call_operand.vmem [shape: f32[2,8,32], index: 0, kind: input, shape index: {}]   ;;  %s92_s1 = inlined_call_operand.vmem [shape: f32[1,64,32], index: 1, kind: input, shape index: {}]   ;;  %s93_s2 = inlined_call_operand.hbm [shape: f32[2,8,32], index: 2, kind: output, shape index: {}]  }
   0x1   :  { %v12_v0 = vld [vmem:[%s91_s0] sm:$0xff]  ;;  %v13_v2 = vld [vmem:[%s91_s0 + $0x8] sm:$0xff] }
   0x2   :  { %v14_v1 = vld [vmem:[%s92_s1] sm:$0xff] }
   0x3   :  { %v15_v3 = vadd.f32 %v14_v1, %v12_v0  ;;  %v16_v4 = vadd.f32 %v14_v1, %v13_v2 }
   0x4   :  { %7 = vsyncpa [#allocation3], 0  ;;  %s61_s15 = smov [#allocation2]  }
   0x5   :  { %s25_s16 = sshll.u32 %s61_s15, 4  ;;  %18 = vst.msk [vmem:[#allocation2] sm:$0xff] %vm17_vm0, %v15_v3  ;;  %19 = vst.msk [vmem:[#allocation2 + $0x8] sm:$0xff] %vm17_vm0, %v16_v4  ;;  %s26_s16 = int_to_ptr.vmem [resolvable:$true] %s25_s16 }
   0x6   :  { %s39_s17 = scalar_lea.vmem %s26_s16, 256  ;;  %p44_p1 = scmp.lt.s32.totalorder %s26_s16, %s26_s16 }
   0x7   :  { %p40_p0 = scmp.ne.s32.totalorder %s26_s16, %s39_s17  ;;  %p45_p2 = scmp.lt.s32.totalorder %s39_s17, %s39_s17 }
   0x9   :  { %p46_p3 = por %p45_p2, %p44_p1 }
   0xb   :  { %p47_p4 = pnand %p46_p3, %p40_p0 }
   0xd   :  { %50 = shalt.err (!%p47_p4)
}
   0xe   :  { %s62_s1 = smov 128   ;;  %s63_s18 = smov 8  }
   0xf   :  { %31 = dma.vmem_to_hbm [thread:$0]  %s26_s16, 256, %s93_s2, [#allocation3], %s62_s1, %s62_s1, %s63_s18  }
  0x10   :  { %59 = dma.done.wait [#allocation3], 256  }
  0x11   :  { %60 = vsyncadd [#allocation3], 4294967040 }
  0x12   :  { %35 = vsyncpa [#allocation3], 1 }

</bundles_post_ra>
